<compile_context>
chip_gen: v7x
topology: tpu7x:2x2x1
jax: 0.10.0
libtpu: 0.0.40
codegen_flags: <defaults>
</compile_context>

<pallas_src>
import math
from functools import partial

import jax
import jax.numpy as jnp
from jax.experimental import pallas as pl
from jax.experimental.pallas import tpu as pltpu


# ----------------------------------------------------------------------------
# Kernel bodies
# ----------------------------------------------------------------------------
def _gelu_f32(h, approx):
    """GELU on an f32 tile. approx=False -> exact erf (torch GELU default)."""
    if approx:
        # tanh approximation: transcendental runs on the EUP slot (free-ish),
        # instead of a long f32 VALU polynomial.
        c = jnp.float32(math.sqrt(2.0 / math.pi))
        return 0.5 * h * (1.0 + jnp.tanh(c * (h + jnp.float32(0.044715) * h * h * h)))
    return 0.5 * h * (1.0 + jax.lax.erf(h * jnp.float32(1.0 / math.sqrt(2.0))))


def ffn_resident_kernel(x_ref, w1_ref, b1_ref, w2_ref, b2_ref, o_ref, *, gelu_approx):
    # Weights-resident fast path: grid = (grid_m,). w1/w2/b1/b2 have constant
    # index maps -> they stay in VMEM across every row tile (DMA'd once).
    h = jnp.dot(x_ref[...], w1_ref[...], preferred_element_type=jnp.float32)
    h = _gelu_f32(h + b1_ref[...], gelu_approx)
    y = jnp.dot(h.astype(w2_ref.dtype), w2_ref[...],
                preferred_element_type=jnp.float32)
    # dropout (eval mode) == identity
    o_ref[...] = (y + b2_ref[...]).astype(o_ref.dtype)


def ffn_streamed_kernel(x_ref, w1_ref, b1_ref, w2_ref, b2_ref, o_ref, acc_ref,
                        *, gelu_approx):
    # F-streamed path: grid = (grid_m, grid_f); fc2 partial sums accumulate in
    # a (tm, D) f32 VMEM scratch across the trailing ("arbitrary") F axis.
    f = pl.program_id(1)

    @pl.when(f == 0)
    def _():
        acc_ref[...] = jnp.zeros_like(acc_ref)

    h = jnp.dot(x_ref[...], w1_ref[...], preferred_element_type=jnp.float32)
    h = _gelu_f32(h + b1_ref[...], gelu_approx)
    acc_ref[...] += jnp.dot(h.astype(w2_ref.dtype), w2_ref[...],
                            preferred_element_type=jnp.float32)

    @pl.when(f == pl.num_programs(1) - 1)
    def _():
        # dropout (eval mode) == identity
        o_ref[...] = (acc_ref[...] + b2_ref[...]).astype(o_ref.dtype)


# ----------------------------------------------------------------------------
# Tile / VMEM sizing helpers
# ----------------------------------------------------------------------------
def _round_up(x, m):
    return -(-x // m) * m


def _vmem_capacity_bytes():
    """Per-core VMEM capacity; conservative 64 MiB (v7x) if the query fails."""
    try:
        return int(pltpu.get_tpu_info().vmem_capacity_bytes)
    except Exception:
        return 64 * 1024 * 1024


def _pick_row_tile(M, target=512):
    """MXU-aligned row tile (multiple of 256) that keeps grid_m >= 2 when M
    allows (so the 'parallel' row axis feeds both v7x TensorCores); falls back
    to 8-alignment only for tiny M."""
    if M <= 256:
        return max(8, _round_up(M, 8))
    tm = max(256, (min(target, M) // 256) * 256)
    if M <= tm:  # would give a single row tile -> split for megacore sharding
        tm = max(256, _round_up(_round_up(M, 2) // 2, 256))
    return tm


def _resident_est(D, F, tm, cs, os_):
    """Per-call VMEM estimate for the weights-resident path (bytes)."""
    return (2 * 2 * D * F * cs              # W1 + W2 (counted double-buffered, safe)
            + 2 * (8 * F + 8 * D) * 4       # sublane-padded bias blocks (x2 buffers)
            + 2 * tm * D * cs               # x row tile (double-buffered)
            + 2 * tm * D * os_              # output tile (double-buffered)
            + tm * F * 4 + tm * F * cs      # f32 h intermediate + compute-dtype copy
            + tm * D * 4)                   # fc2 f32 result before cast


def _stream_est(D, tm, tf, cs, os_):
    """Per-step VMEM estimate for the F-streamed path (bytes)."""
    per_tf = 4 * D * cs + 64 + tm * (4 + cs)       # W1+W2 chunks (x2 buf) + b1 + h (f32+cast)
    fixed = 64 * D + 2 * tm * D * (cs + os_ + 4)   # b2 + x/out tiles + acc scratch + fc2 temp
    return tf * per_tf + fixed


def _max_stream_tf(D, tm, cs, os_, budget):
    """Largest lane-aligned hidden-dim tile whose per-step estimate fits."""
    per_tf = 4 * D * cs + 64 + tm * (4 + cs)
    fixed = 64 * D + 2 * tm * D * (cs + os_ + 4)
    tf = (budget - fixed) // per_tf
    return (tf // 128) * 128        # may be <= 0 if `fixed` alone busts the budget


# ----------------------------------------------------------------------------
# Wrapper
# ----------------------------------------------------------------------------
def feed_forward_layer(x, w1, b1, w2, b2, *, tm=None, compute_dtype=jnp.bfloat16,
                       out_dtype=None, gelu_approx=False):
    """x: (B, T, D); w1: (D, F); b1: (F,); w2: (F, D); b2: (D,)."""
    B, T, D = x.shape
    F = w1.shape[1]
    M = B * T
    out_dtype = x.dtype if out_dtype is None else jnp.dtype(out_dtype)

    cs = jnp.dtype(compute_dtype).itemsize
    os_ = jnp.dtype(out_dtype).itemsize

    capacity = _vmem_capacity_bytes()
    budget = int(capacity * 0.8)            # ~20% headroom for compiler temporaries

    # ---- choose tiles / path ------------------------------------------------
    if tm is None:
        tm = _pick_row_tile(M)
    else:
        tm = max(8, (min(tm, _round_up(M, 8)) // 8) * 8)

    use_resident = _resident_est(D, F, tm, cs, os_) <= budget
    tf, Fp, grid_f = F, F, 1
    if not use_resident:
        # Shrink tm (never below 256) until at least a tf=128 chunk fits,
        # then derive the largest lane-aligned tf within the budget.
        while tm > 256 and _max_stream_tf(D, tm, cs, os_, budget) < 128:
            tm = max(256, ((tm // 2) // 256) * 256)
        tf = max(128, _max_stream_tf(D, tm, cs, os_, budget))
        tf = min(tf, _round_up(F, 128))
        Fp = _round_up(F, tf)
        grid_f = Fp // tf

    grid_m = -(-M // tm)
    Mp = grid_m * tm

    # ---- materialize operands (one-time casts / padding, outside the grid) --
    x2 = x.reshape(M, D).astype(compute_dtype)
    if Mp != M:
        x2 = jnp.pad(x2, ((0, Mp - M), (0, 0)))
    w1c = w1.astype(compute_dtype)
    w2c = w2.astype(compute_dtype)
    b1_2 = b1.reshape(1, F).astype(jnp.float32)
    b2_2 = b2.reshape(1, D).astype(jnp.float32)
    if Fp != F:
        # Zero hidden-dim padding: gelu(0 + 0) == 0 and zero W2 rows => no effect.
        w1c = jnp.pad(w1c, ((0, 0), (0, Fp - F)))
        w2c = jnp.pad(w2c, ((0, Fp - F), (0, 0)))
        b1_2 = jnp.pad(b1_2, ((0, 0), (0, Fp - F)))

    # ---- VMEM limit: generation-aware, never below the actual requirement ---
    est = (_resident_est(D, F, tm, cs, os_) if use_resident
           else _stream_est(D, tm, tf, cs, os_))
    vmem_limit = int(min(max(est * 1.25, 32 * 1024 * 1024), capacity))

    # ---- build the pallas_call ----------------------------------------------
    if use_resident:
        grid = (grid_m,)
        in_specs = [
            pl.BlockSpec((tm, D), lambda i: (i, 0)),   # x row tile
            pl.BlockSpec((D, Fp), lambda i: (0, 0)),   # W1 (VMEM-resident)
            pl.BlockSpec((1, Fp), lambda i: (0, 0)),   # b1
            pl.BlockSpec((Fp, D), lambda i: (0, 0)),   # W2 (VMEM-resident)
            pl.BlockSpec((1, D), lambda i: (0, 0)),    # b2
        ]
        out_spec = pl.BlockSpec((tm, D), lambda i: (i, 0))
        scratch = []
        kernel = partial(ffn_resident_kernel, gelu_approx=gelu_approx)
        dims = ("parallel",)
    else:
        grid = (grid_m, grid_f)
        in_specs = [
            pl.BlockSpec((tm, D), lambda i, f: (i, 0)),   # x row tile
            pl.BlockSpec((D, tf), lambda i, f: (0, f)),   # W1 chunk
            pl.BlockSpec((1, tf), lambda i, f: (0, f)),   # b1 chunk
            pl.BlockSpec((tf, D), lambda i, f: (f, 0)),   # W2 chunk
            pl.BlockSpec((1, D), lambda i, f: (0, 0)),    # b2
        ]
        out_spec = pl.BlockSpec((tm, D), lambda i, f: (i, 0))
        scratch = [pltpu.VMEM((tm, D), jnp.float32)]
        kernel = partial(ffn_streamed_kernel, gelu_approx=gelu_approx)
        dims = ("parallel", "arbitrary")

    out2 = pl.pallas_call(
        kernel,
        out_shape=jax.ShapeDtypeStruct((Mp, D), out_dtype),
        grid_spec=pltpu.PrefetchScalarGridSpec(
            num_scalar_prefetch=0,
            grid=grid,
            in_specs=in_specs,
            out_specs=out_spec,
            scratch_shapes=scratch),
        compiler_params=pltpu.CompilerParams(
            dimension_semantics=dims,
            vmem_limit_bytes=vmem_limit),
    )(x2, w1c, b1_2, w2c, b2_2)

    if Mp != M:
        out2 = out2[:M]
    return out2.reshape(B, T, D)


# ----------------------------------------------------------------------------
# Param init (mimics torch.nn.Linear: uniform +/- 1/sqrt(fan_in))
# ----------------------------------------------------------------------------
def init_params(key, input_dim, feedforward_dim):
    k1, k2, k3, k4 = jax.random.split(key, 4)
    bound1 = 1.0 / math.sqrt(input_dim)
    bound2 = 1.0 / math.sqrt(feedforward_dim)
    # Stored pre-transposed: fc1 weight is (out, in) in torch; here (in, out).
    w1 = jax.random.uniform(k1, (input_dim, feedforward_dim), jnp.float32, -bound1, bound1)
    b1 = jax.random.uniform(k2, (feedforward_dim,), jnp.float32, -bound1, bound1)
    w2 = jax.random.uniform(k3, (feedforward_dim, input_dim), jnp.float32, -bound2, bound2)
    b2 = jax.random.uniform(k4, (input_dim,), jnp.float32, -bound2, bound2)
    return w1, b1, w2, b2


if __name__ == "__main__":
    key = jax.random.PRNGKey(0)
    k_x, k_p = jax.random.split(key)

    batch, seq, dim = 2, 8, 32
    ff_dim = dim * 4  # 128

    x = jax.random.normal(k_x, (batch, seq, dim), dtype=jnp.float32)
    w1, b1, w2, b2 = init_params(k_p, dim, ff_dim)

    # tm=8 at this tiny demo size -> 2 row tiles, exercising the multi-step
    # pipelined grid and the VMEM-resident weight revisit path. In production
    # leave tm=None to get an MXU-aligned 256/512 row tile automatically.
    out = feed_forward_layer(x, w1, b1, w2, b2, tm=8)
    out = jax.block_until_ready(out)

    # Reference in plain f32 JAX. The kernel feeds bf16 operands to the MXU
    # (f32 accumulation), so compare with a correspondingly looser tolerance.
    h_ref = x.reshape(-1, dim) @ w1 + b1
    h_ref = 0.5 * h_ref * (1.0 + jax.lax.erf(h_ref / jnp.sqrt(2.0)))
    ref = (h_ref @ w2 + b2).reshape(batch, seq, dim)
    assert jnp.allclose(out, ref, atol=2e-2, rtol=2e-2), "mismatch vs reference"

    print("KERNEL_OK")
</pallas_src>

<mosaic_0001>
module attributes {stable_mosaic.version = 11 : i64} {
  func.func @ffn_resident_kernel(%arg0: i32, %arg1: memref<8x32xbf16, #tpu.memory_space<vmem>>, %arg2: memref<32x128xbf16, #tpu.memory_space<vmem>>, %arg3: memref<1x128xf32, #tpu.memory_space<vmem>>, %arg4: memref<128x32xbf16, #tpu.memory_space<vmem>>, %arg5: memref<1x32xf32, #tpu.memory_space<vmem>>, %arg6: memref<8x32xf32, #tpu.memory_space<vmem>>) attributes {dimension_semantics = [#tpu.dimension_semantics<parallel>], iteration_bounds = array<i64: 2>, scalar_prefetch = 0 : i64, scratch_operands = 0 : i64, tpu.core_type = #tpu.core_type<tc>, window_params = [{transform_indices = @transform_0, window_bounds = array<i64: 8, 32>}, {pipeline_mode = #tpu.pipeline_mode<synchronous>, transform_indices = @transform_1, window_bounds = array<i64: 32, 128>}, {pipeline_mode = #tpu.pipeline_mode<synchronous>, transform_indices = @transform_2, window_bounds = array<i64: 1, 128>}, {pipeline_mode = #tpu.pipeline_mode<synchronous>, transform_indices = @transform_3, window_bounds = array<i64: 128, 32>}, {pipeline_mode = #tpu.pipeline_mode<synchronous>, transform_indices = @transform_4, window_bounds = array<i64: 1, 32>}, {transform_indices = @transform_5, window_bounds = array<i64: 8, 32>}]} {
    %c0 = arith.constant 0 : index
    %c0_0 = arith.constant 0 : index
    %0 = vector.load %arg1[%c0, %c0_0] : memref<8x32xbf16, #tpu.memory_space<vmem>>, vector<8x32xbf16>
    %c0_1 = arith.constant 0 : index
    %c0_2 = arith.constant 0 : index
    %1 = vector.load %arg2[%c0_1, %c0_2] : memref<32x128xbf16, #tpu.memory_space<vmem>>, vector<32x128xbf16>
    %cst = arith.constant dense<0.000000e+00> : vector<8x128xf32>
    %2 = tpu.matmul %0, %1, %cst {dimension_numbers = #tpu.dot_dimension_numbers<[1], [0], [0], [1], [0, 0, 1, 1], [], []>} : vector<8x32xbf16>, vector<32x128xbf16>, vector<8x128xf32> -> vector<8x128xf32>
    %c0_3 = arith.constant 0 : index
    %c0_4 = arith.constant 0 : index
    %3 = vector.load %arg3[%c0_3, %c0_4] : memref<1x128xf32, #tpu.memory_space<vmem>>, vector<1x128xf32>
    %4 = vector.broadcast %3 : vector<1x128xf32> to vector<8x128xf32>
    %5 = arith.addf %2, %4 : vector<8x128xf32>
    %cst_5 = arith.constant 5.000000e-01 : f32
    %6 = vector.broadcast %cst_5 : f32 to vector<8x128xf32>
    %7 = arith.mulf %6, %5 : vector<8x128xf32>
    %cst_6 = arith.constant 0.707106769 : f32
    %8 = vector.broadcast %cst_6 : f32 to vector<8x128xf32>
    %9 = arith.mulf %5, %8 : vector<8x128xf32>
    %10 = math.erf %9 : vector<8x128xf32>
    %cst_7 = arith.constant 1.000000e+00 : f32
    %11 = vector.broadcast %cst_7 : f32 to vector<8x128xf32>
    %12 = arith.addf %11, %10 : vector<8x128xf32>
    %13 = arith.mulf %7, %12 : vector<8x128xf32>
    %14 = arith.truncf %13 : vector<8x128xf32> to vector<8x128xbf16>
    %c0_8 = arith.constant 0 : index
    %c0_9 = arith.constant 0 : index
    %15 = vector.load %arg4[%c0_8, %c0_9] : memref<128x32xbf16, #tpu.memory_space<vmem>>, vector<128x32xbf16>
    %cst_10 = arith.constant dense<0.000000e+00> : vector<8x32xf32>
    %16 = tpu.matmul %14, %15, %cst_10 {dimension_numbers = #tpu.dot_dimension_numbers<[1], [0], [0], [1], [0, 0, 1, 1], [], []>} : vector<8x128xbf16>, vector<128x32xbf16>, vector<8x32xf32> -> vector<8x32xf32>
    %c0_11 = arith.constant 0 : index
    %c0_12 = arith.constant 0 : index
    %17 = vector.load %arg5[%c0_11, %c0_12] : memref<1x32xf32, #tpu.memory_space<vmem>>, vector<1x32xf32>
    %18 = vector.broadcast %17 : vector<1x32xf32> to vector<8x32xf32>
    %19 = arith.addf %16, %18 : vector<8x32xf32>
    %c0_13 = arith.constant 0 : index
    %c0_14 = arith.constant 0 : index
    %20 = vector.load %arg6[%c0_13, %c0_14] : memref<8x32xf32, #tpu.memory_space<vmem>>, vector<8x32xf32>
    tpu.vector_store %arg6[%c0_13, %c0_14], %19 {strides = array<i32>} : memref<8x32xf32, #tpu.memory_space<vmem>>, vector<8x32xf32>,
    return
  }
  func.func @transform_0(%arg0: i32) -> (i32, i32) {
    %c0_i32 = arith.constant 0 : i32
    %c0_i32_0 = arith.constant 0 : i32
    return %arg0, %c0_i32 : i32, i32
  }
  func.func @transform_1(%arg0: i32) -> (i32, i32) {
    %c0_i32 = arith.constant 0 : i32
    %c0_i32_0 = arith.constant 0 : i32
    %c0_i32_1 = arith.constant 0 : i32
    return %c0_i32, %c0_i32_0 : i32, i32
  }
  func.func @transform_2(%arg0: i32) -> (i32, i32) {
    %c0_i32 = arith.constant 0 : i32
    %c0_i32_0 = arith.constant 0 : i32
    %c0_i32_1 = arith.constant 0 : i32
    return %c0_i32, %c0_i32_0 : i32, i32
  }
  func.func @transform_3(%arg0: i32) -> (i32, i32) {
    %c0_i32 = arith.constant 0 : i32
    %c0_i32_0 = arith.constant 0 : i32
    %c0_i32_1 = arith.constant 0 : i32
    return %c0_i32, %c0_i32_0 : i32, i32
  }
  func.func @transform_4(%arg0: i32) -> (i32, i32) {
    %c0_i32 = arith.constant 0 : i32
    %c0_i32_0 = arith.constant 0 : i32
    %c0_i32_1 = arith.constant 0 : i32
    return %c0_i32, %c0_i32_0 : i32, i32
  }
  func.func @transform_5(%arg0: i32) -> (i32, i32) {
    %c0_i32 = arith.constant 0 : i32
    %c0_i32_0 = arith.constant 0 : i32
    return %arg0, %c0_i32 : i32, i32
  }
}

</mosaic_0001>

<bundles_post_ra>
// kernel: tpu_custom_call.1
= control target key start
LH: loop header
LB: loop body
LE: loop exit
PB: predicated region body
PF: predicated region fallthrough
CT: control target
= control target key end

     0   :  { %10 = vsyncpa [#allocation3], 0  ;;  %s831_s0 = inlined_call_operand.vmem [shape: bf16[16,32], index: 0, kind: input, shape index: {}]   ;;  %s832_s1 = inlined_call_operand.vmem [shape: bf16[32,128], index: 1, kind: input, shape index: {}]   ;;  %s833_s2 = inlined_call_operand.vmem [shape: f32[1,128], index: 2, kind: input, shape index: {}]   ;;  %s834_s3 = inlined_call_operand.vmem [shape: bf16[128,32], index: 3, kind: input, shape index: {}]   ;;  %s835_s4 = inlined_call_operand.vmem [shape: f32[1,32], index: 4, kind: input, shape index: {}]   ;;  %s836_s5 = inlined_call_operand.hbm [shape: f32[16,32], index: 5, kind: output, shape index: {}]  }
   0x1   :  { %12 = vsyncpa [#allocation3 + $0x1], 0  ;;  %s693_s18 = smov 0   ;;  %s695_s19 = smov 0  }
   0x2   :  { %s697_s20 = smov 0   ;;  %s699_s21 = smov 0  }
   0x3 LB: > { %s714_s22 = sadd.s32 4294967295, %s658_s21   ;;  %s480_s23 = sadd.s32 4294967294, %s658_s21   ;;  %s658_s21 = sphi %s699_s21, %s842_s21   ;;  %s654_s20 = sphi %s697_s20, %s841_s20   ;;  %s650_s19 = sphi %s695_s19, %s840_s19   ;;  %s646_s18 = sphi %s693_s18, %s839_s18  }
   0x4   : > { %s718_s24 = sadd.s32 1, %s658_s21   ;;  %s135_s25 = sadd.s32 1, %s654_s20 }
   0x5   : > { %s132_s26 = ssub.s32 %s658_s21, %s718_s24  ;;  %p145_p0 = scmp.ne.s32.totalorder %s654_s20, %s650_s19 }
   0x6   : > { %p133_p1 = scmp.eq.s32.totalorder %s132_s26, 0  ;;  %p146_p2 = scmp.eq.s32.totalorder %s714_s22, 1 }
   0x7   : > { %p151_p3 = scmp.ne.s32.totalorder %s650_s19, %s646_s18  ;;  %p152_p4 = scmp.eq.s32.totalorder %s480_s23, 1 }
   0x8   : > { %s729_s27 = scalar_select %p133_p1, %s654_s20, %s135_s25  }
   0x9   : > { %p731_p5 = por %p146_p2, %p145_p0  ;;  %p735_p6 = por %p152_p4, %p151_p3 }
   0xa   : > { %p483_p7 = scmp.ge.s32.totalorder %s658_s21, 1  ;;  %p189_p8 = scmp.lt.s32.totalorder %s658_s21, 3 }
   0xc   : > { %p190_p9 = pnand %p483_p7, %p189_p8 }
   0xd   : > { %v584_v0 = vld [vmem:[%s832_s1] sm:$0xff] (!%p190_p9)   ;;  %v660_v1 = vmov (!%p190_p9), 0.0   ;;  %v585_v2 = vld [vmem:[%s832_s1 + $0x8] sm:$0xff] (!%p190_p9)   ;;  %vm661_vm0 = vmmov (!%p190_p9), 0   ;;  %p216_p10 = scmp.lt.s32.totalorder (!%p190_p9), %s714_s22, 1  ;;  %vm245_vm1 = vcmask (!%p190_p9), 261120  }
   0xe   : > { %193 = sbr.rel (%p190_p9) target bundleno = 487 (0x1e7), region = 40  ;;  %515 = vmatprep.subr.bf16.mxu0 (!%p190_p9), %v660_v1  ;;  %523 = vmatprep.subr.bf16.mxu1 (!%p190_p9), %v660_v1  ;;  %v586_v3 = vld [vmem:[%s834_s3] sm:$0xff] (!%p190_p9)   ;;  %v587_v4 = vld [vmem:[%s834_s3 + $0x8] sm:$0xff] (!%p190_p9)   ;;  %v588_v6 = vld [vmem:[%s834_s3 + $0x10] sm:$0xff] (!%p190_p9)   ;;  %s213_s16 = sand.u32 (!%p190_p9), 1, %s650_s19  }
   0xf   : > { %516 = vmatpush3.bf16.msra.mxu0 (!%p190_p9), %v584_v0  ;;  %519 = vmatprep.mubr.msk.bf16.mxu0 (!%p190_p9), %vm661_vm0, %v660_v1  ;;  %v589_v7 = vld [vmem:[%s834_s3 + $0x18] sm:$0xff] (!%p190_p9)   ;;  %v590_v8 = vld [vmem:[%s834_s3 + $0x20] sm:$0xff] (!%p190_p9)   ;;  %v591_v9 = vld [vmem:[%s834_s3 + $0x28] sm:$0xff] (!%p190_p9)   ;;  %s500_s26 = sshll.u32 (!%p190_p9), %s714_s22, 7 }
  0x10   : > { %517 = vmatprep.subr.bf16.mxu0 (!%p190_p9), %v660_v1  ;;  %539 = vmatprep.mubr.msk.bf16.mxu1 (!%p190_p9), %vm661_vm0, %v660_v1  ;;  %v592_v10 = vld [vmem:[%s834_s3 + $0x30] sm:$0xff] (!%p190_p9)   ;;  %v593_v11 = vld [vmem:[%s834_s3 + $0x38] sm:$0xff] (!%p190_p9)   ;;  %v486_v12 = vld [vmem:[%s833_s2] ss:$0 sm:$0xff] (!%p190_p9)  ;;  %s788_s9 = scalar_lea.hbm (!%p190_p9), %s836_s5, %s500_s26 }
  0x11   : > { %524 = vmatpush3.bf16.msra.mxu1 (!%p190_p9), %v586_v3  ;;  %v490_v24 = vld [vmem:[%s835_s4] ss:$0 sm:$0xff] (!%p190_p9) }
  0x12   : > { %525 = vmatprep.subr.bf16.mxu1 (!%p190_p9), %v660_v1 }
  0x13   : > { %518 = vmatpush3.bf16.msra.mxu0 (!%p190_p9), %v585_v2 }
  0x15   : > { %s217_s11 = scalar_select %p216_p10, %s714_s22, 1  ;;  %526 = vmatpush3.bf16.msra.mxu1 %v587_v4 }
  0x16   : > { %527 = vmatprep.subr.bf16.mxu1 %v660_v1  ;;  %s408_s22 = scalar_lea.sflag [#allocation3], %s213_s16 }
  0x17   : > { %s485_s14 = sshll.u32 %s217_s11, 2  ;;  %s662_s11 = smov [#allocation2]  }
  0x18   : > { %s219_s17 = scalar_lea.vmem %s831_s0, %s485_s14  ;;  %s600_s12 = sshll.u32 %s662_s11, 4  ;;  %s601_s12 = int_to_ptr.vmem [resolvable:$false] %s600_s12 }
  0x19   : > { %v221_v5 = vld [vmem:[%s219_s17] sm:$0xf]  ;;  %528 = vmatpush3.bf16.msra.mxu1 %v588_v6  ;;  %s484_s17 = sshll.u32 %s213_s16, 3  ;;  %s602_s13 = scalar_lea.vmem %s601_s12, 256 }
  0x1a   : > { %520 = vmatmul.mubr.msk.bf16.vlgmr.msra.gmra.mrb[0].mxu0 %vm245_vm1, %v221_v5  ;;  %529 = vmatprep.subr.bf16.mxu1 %v660_v1  ;;  %s215_s30 = scalar_lea.vmem [#allocation2], %s484_s17 }
  0x1b   : > { %s421_s6 = sshll.u32 %s215_s30, 4  ;;  %s790_s6 = int_to_ptr.vmem [resolvable:$true] %s421_s6 }
  0x1c   : > { %s596_s10 = scalar_lea.vmem %s790_s6, 128  ;;  %p603_p0 = scmp.lt.s32.totalorder %s790_s6, %s601_s12 }
  0x1d   : > { %530 = vmatpush3.bf16.msra.mxu1 %v589_v7  ;;  %p597_p11 = scmp.ne.s32.totalorder %s790_s6, %s596_s10  ;;  %p604_p1 = scmp.lt.s32.totalorder %s602_s13, %s596_s10 }
  0x1e   : > { %531 = vmatprep.subr.bf16.mxu1 %v660_v1 }
  0x1f   : > { %p598_p12 = pnand %p597_p11, %p731_p5  ;;  %p605_p2 = por %p604_p1, %p603_p0 }
  0x21   : > { %532 = vmatpush3.bf16.msra.mxu1 %v590_v8  ;;  %p599_p13 = pneg %p598_p12 }
  0x22   : > { %533 = vmatprep.subr.bf16.mxu1 %v660_v1 }
  0x23   : > { %p606_p3 = pnand %p605_p2, %p599_p13 }
  0x25   : > { %534 = vmatpush3.bf16.msra.mxu1 %v591_v9 }
  0x26   : > { %535 = vmatprep.subr.bf16.mxu1 %v660_v1 }
  0x29   : > { %536 = vmatpush3.bf16.msra.mxu1 %v592_v10 }
  0x2a   : > { %537 = vmatprep.subr.bf16.mxu1 %v660_v1 }
  0x2d   : > { %538 = vmatpush3.bf16.msra.mxu1 %v593_v11 }
  0xed   : > { %v283_v13 = vpop.f32.mrb[0].mxu0 }
  0xee   : > { %v284_v14 = vadd.f32 %v486_v12, %v283_v13  ;;  %v521_v15 = vpop.f32.mrb[1].mxu0 }
  0xef   : > { %v286_v16 = vpop.f32.mrb[2].mxu0 }
  0xf0   : > { %v290_v17 = vmul.f32 0.70710677, %v284_v14  ;;  %v522_v18 = vpop.f32.mrb[3].mxu0  ;;  %v289_v20 = vmul.f32 0.5, %v284_v14 }
  0xf2   : > { %594 = verf.f32 %v290_v17 }
  0xfc   : > { %v595_v19 = vpop.eup %594 }
  0xfd   : > { %v292_v21 = vadd.f32 1.0, %v595_v19 }
  0xff   : > { %v293_v22 = vmul.f32 %v292_v21, %v289_v20 }
 0x101   : > { %v294_v23 = vpack.c.bf16 %v293_v22, %v293_v22 }
 0x103   : > { %540 = vmatmul.mubr.bf16.vlgmr.msra.gmra.mrb[0].mxu1 %v294_v23 }
 0x1d6   : > { %v400_v25 = vpop.f32.mrb[0].mxu1 }
 0x1d7   : > { %v401_v26 = vadd.f32 %v490_v24, %v400_v25  ;;  %v541_v27 = vpop.f32.mrb[1].mxu1 }
 0x1d8   : > { %v403_v28 = vpop.f32.mrb[2].mxu1 }
 0x1d9   : > { %v542_v29 = vpop.f32.mrb[3].mxu1  ;;  %406 = vst.msk [vmem:[%s215_s30] sm:$0xff] %vm245_vm1, %v401_v26 }
 0x1da   : > { %609 = shalt.err (!%p606_p3)
}
 0x1db   : > { %s610_s14 = scalar_lea.hbm %s788_s9, 128  ;;  %s614_s17 = scalar_lea.hbm %s836_s5, 256 }
 0x1dc   : > { %p611_p4 = scmp.ne.s32.totalorder %s788_s9, %s610_s14  ;;  %p615_p9 = scmp.lt.u32.totalorder %s788_s9, %s836_s5 }
 0x1dd   : > { %p616_p10 = scmp.lt.u32.totalorder %s614_s17, %s610_s14  ;;  %p618_p12 = scmp.lt.u32.totalorder %s610_s14, %s788_s9 }
 0x1de   : > { %p612_p7 = pnand %p611_p4, %p731_p5 }
 0x1df   : > { %p617_p11 = por %p616_p10, %p615_p9 }
 0x1e0   : > { %p613_p8 = pneg %p612_p7 }
 0x1e1   : > { %p619_p13 = por %p618_p12, %p617_p11 }
 0x1e3   : > { %p620_p0 = pnand %p619_p13, %p613_p8 }
 0x1e5   : > { %623 = shalt.err (!%p620_p0)
}
 0x1e6   : > { %543 = dma.vmem_to_hbm [thread:$0]  (%p731_p5), %s790_s6, 128, %s788_s9, %s408_s22  }
 0x1e7 PF: > { %p549_p1 = scmp.ge.s32.totalorder %s658_s21, 2  ;;  %s433_s26 = sand.u32 1, %s646_s18  }
 0x1e8   : > { %s434_s30 = scalar_lea.sflag [#allocation3], %s433_s26 }
 0x1e9   : > { %p546_p2 = pnand %p549_p1, %p735_p6 }
 0x1eb   : > { %641 = dma.done.wait (!%p546_p2), %s434_s30, 128  }
 0x1ec   : > { %643 = vsyncadd (!%p546_p2), %s434_s30, 4294967168  ;;  %p15_p3 = scmp.ge.s32.totalorder %s718_s24, 4   ;;  %s839_s18 = smov %s650_s19 }
 0x1ed   : > { %s840_s19 = smov %s654_s20  ;;  %s841_s20 = smov %s729_s27 }
 0x1ee   : > { %s842_s21 = smov %s718_s24  ;;  %17 = sbr.rel (!%p15_p3) target bundleno = 3 (0x3), region = 75 }
 0x1f5   :  { %439 = vsyncpa [#allocation3], 1 }
 0x1f6   :  { %441 = vsyncpa [#allocation3 + $0x1], 1 }

</bundles_post_ra>
